<compile_context>
chip_gen: v7x
topology: tpu7x:2x2x1
jax: 0.10.0
libtpu: 0.0.40
codegen_flags: <defaults>
</compile_context>

<pallas_src>
import math
import functools

import jax
import jax.numpy as jnp
from jax.experimental import pallas as pl
from jax.experimental.pallas import tpu as pltpu


def _round_up(x, m):
    return -(-x // m) * m


def _cdiv(a, b):
    return -(-a // b)


@functools.lru_cache(maxsize=1)
def _chip_budgets():
    """(per_block_f32_budget_bytes, vmem_limit_bytes) for the local chip.

    The kernel is purely HBM-bandwidth bound; tile size is the only lever.
    The pipeline holds roughly 6-7x the block budget (buffered in + out at the
    I/O dtype plus f32 upcast temporaries), which stays inside vmem_limit.
    """
    vmem_phys = None
    try:
        vmem_phys = int(pltpu.get_tpu_info().vmem_capacity_bytes)
    except Exception:
        vmem_phys = None
    if vmem_phys is not None and vmem_phys >= (96 << 20):
        # v5e / v6e: 128 MiB physical VMEM per TensorCore.
        return 6 << 20, 96 << 20
    # v7x (64 MiB per TensorCore) or unknown chip -> conservative.
    return 4 << 20, 48 << 20


def _rmsnorm_kernel(x_ref, g_ref, o_ref):
    # x_ref block: (C, T) (batch dim squeezed in path A).  g_ref: (C, 1),
    # already scaled by sqrt(C) on the host.  Reduction over the sublane
    # (channel) axis; f32 accumulation; rsqrt on the EUP slot.
    x = x_ref[...].astype(jnp.float32)
    g = g_ref[...].astype(jnp.float32)
    ssq = jnp.sum(x * x, axis=-2, keepdims=True)
    # 1 / max(sqrt(ssq), 1e-12) == rsqrt(max(ssq, 1e-24))  (F.normalize eps).
    inv = jax.lax.rsqrt(jnp.maximum(ssq, 1e-24))
    o_ref[...] = ((x * inv) * g).astype(o_ref.dtype)


def _pick_lane_tile(C, N, n_outer, block_budget):
    """Lane-dim tile: a multiple of 128 (cdiv grid, partial last tile ok) or
    the full extent N.  Budgeted against the padded f32 footprint of one
    (C, tile) block, and split so the total grid has >= 2 steps whenever the
    lane extent allows it (DMA/compute overlap; v7x megacore occupancy)."""
    c_pad = _round_up(max(C, 1), 8)                       # sublane pack (f32)
    cap = (block_budget // (c_pad * 4)) // 128 * 128
    cap = min(max(cap, 128), 2048)                        # >= 1 vreg width
    if _round_up(N, 128) <= cap:
        tl = N                                            # full-extent block (always legal)
    else:
        tl = cap
    if n_outer * _cdiv(N, tl) < 2 and N > 128:
        # Keep at least 2 grid steps; the split tile is a multiple of 128.
        tl = min(tl, _round_up(_cdiv(N, 2), 128))
    return tl


def _lane_spec(block_shape, index_map, buffered):
    if buffered:
        try:
            # 3-deep buffering hides DMA issue latency for short strided rows.
            return pl.BlockSpec(block_shape, index_map,
                                pipeline_mode=pl.Buffered(3))
        except Exception:
            pass  # older jax without pipeline_mode / Buffered -> default 2-deep
    return pl.BlockSpec(block_shape, index_map)


def rmsnorm_pallas(x, g):
    """x: (B, C, L), g: (1, C, 1) -> (B, C, L).  RMSNorm over the C axis."""
    B, C, L = x.shape
    itemsize = jnp.dtype(x.dtype).itemsize
    block_budget, vmem_limit = _chip_budgets()

    # Fold the sqrt(C) constant into g once on the host.
    g2d = (g.reshape(C, 1) * math.sqrt(C)).astype(jnp.float32)

    cost = pl.CostEstimate(
        flops=5 * B * C * L,
        transcendentals=B * L,
        bytes_accessed=2 * B * C * L * itemsize + C * 4,
    )

    if L >= 128:
        # Path A: keep NCL layout; lane-dense tiles of L on a cdiv grid.  The
        # last tile may be partial: columns are independent, the ssq clamp
        # keeps padded columns finite, and out-of-bounds stores are masked.
        tl = _pick_lane_tile(C, L, B, block_budget)
        grid = (B, _cdiv(L, tl))
        steps = grid[0] * grid[1]
        x_spec = _lane_spec(
            (pl.Squeezed(), C, tl), lambda b, l: (b, 0, l),
            buffered=(tl * itemsize <= 1024 and steps >= 2))
        return pl.pallas_call(
            _rmsnorm_kernel,
            out_shape=jax.ShapeDtypeStruct((B, C, L), x.dtype),
            grid_spec=pltpu.PrefetchScalarGridSpec(
                num_scalar_prefetch=0,
                grid=grid,
                in_specs=[
                    x_spec,
                    pl.BlockSpec((C, 1), lambda b, l: (0, 0)),
                ],
                out_specs=pl.BlockSpec((pl.Squeezed(), C, tl),
                                       lambda b, l: (b, 0, l)),
            ),
            compiler_params=pltpu.CompilerParams(
                dimension_semantics=("parallel", "parallel"),
                vmem_limit_bytes=vmem_limit),
            cost_estimate=cost,
        )(x, g2d)

    # Path B: small L (< 128).  Present the data as a lane-dense (C, B*L)
    # slab (batch merged into the lane axis) so vregs and stores are dense.
    # The transpose is wrapper-side layout plumbing handled by XLA.
    N = B * L
    xt = jnp.transpose(x, (1, 0, 2)).reshape(C, N)
    tn = _pick_lane_tile(C, N, 1, block_budget)
    grid = (_cdiv(N, tn),)
    x_spec = _lane_spec(
        (C, tn), lambda i: (0, i),
        buffered=(tn * itemsize <= 1024 and grid[0] >= 2))
    yt = pl.pallas_call(
        _rmsnorm_kernel,
        out_shape=jax.ShapeDtypeStruct((C, N), x.dtype),
        grid_spec=pltpu.PrefetchScalarGridSpec(
            num_scalar_prefetch=0,
            grid=grid,
            in_specs=[
                x_spec,
                pl.BlockSpec((C, 1), lambda i: (0, 0)),
            ],
            out_specs=pl.BlockSpec((C, tn), lambda i: (0, i)),
        ),
        compiler_params=pltpu.CompilerParams(
            dimension_semantics=("parallel",),
            vmem_limit_bytes=vmem_limit),
        cost_estimate=cost,
    )(xt, g2d)
    return jnp.transpose(yt.reshape(C, B, L), (1, 0, 2))


class PreNormPallas:
    """PreNorm: x -> fn(RMSNorm(x)).  RMSNorm runs in the Pallas kernel."""

    def __init__(self, dim, fn=None):
        self.dim = dim
        # nn.Parameter(torch.ones(1, dim, 1)) -> deterministic init of ones.
        self.g = jnp.ones((1, dim, 1), dtype=jnp.float32)
        # TODO(synk): fn is an arbitrary wrapped nn.Module in PyTorch; applied
        # outside the kernel, identity by default.
        self.fn = fn if fn is not None else (lambda y: y)

    def __call__(self, x):
        return self.fn(rmsnorm_pallas(x, self.g))


def _reference(x, g):
    # Pure-JAX reference mirroring the PyTorch forward (F.normalize eps=1e-12).
    xf = x.astype(jnp.float32)
    norm = jnp.sqrt(jnp.sum(xf * xf, axis=1, keepdims=True))
    norm = jnp.maximum(norm, 1e-12)
    return (xf / norm) * g * math.sqrt(x.shape[1])


if __name__ == "__main__":
    key = jax.random.PRNGKey(0)
    k1, k2, k3, k4 = jax.random.split(key, 4)

    # Case 1: L < 128 -> lane-dense (C, B*L) slab path.
    B, C, L = 2, 8, 16
    x1 = jax.random.normal(k1, (B, C, L), dtype=jnp.float32)
    m1 = PreNormPallas(dim=C)
    o1 = jax.block_until_ready(m1(x1))
    assert o1.shape == (B, C, L)
    assert jnp.allclose(o1, _reference(x1, m1.g), atol=1e-5, rtol=1e-5)

    # Case 2: L >= 128, one full-extent lane tile per batch element (2 steps).
    B, C, L = 2, 8, 512
    x2 = jax.random.normal(k2, (B, C, L), dtype=jnp.float32)
    m2 = PreNormPallas(dim=C)
    o2 = jax.block_until_ready(m2(x2))
    assert jnp.allclose(o2, _reference(x2, m2.g), atol=1e-5, rtol=1e-5)

    # Case 3: B=1 forces an occupancy split -> cdiv grid with a partial last
    # lane tile (exercises the masked-writeback path and short-row buffering).
    B, C, L = 1, 8, 384
    x3 = jax.random.normal(k3, (B, C, L), dtype=jnp.float32)
    m3 = PreNormPallas(dim=C)
    o3 = jax.block_until_ready(m3(x3))
    assert jnp.allclose(o3, _reference(x3, m3.g), atol=1e-5, rtol=1e-5)

    # Case 4: bf16 I/O (f32 accumulation inside the kernel).
    B, C, L = 2, 16, 256
    x4 = jax.random.normal(k4, (B, C, L), dtype=jnp.float32).astype(jnp.bfloat16)
    m4 = PreNormPallas(dim=C)
    o4 = jax.block_until_ready(m4(x4))
    assert o4.dtype == jnp.bfloat16
    ref4 = _reference(x4.astype(jnp.float32), m4.g)
    assert jnp.allclose(o4.astype(jnp.float32), ref4, atol=3e-2, rtol=3e-2)

    print("KERNEL_OK")
</pallas_src>

<mosaic_0001>
module attributes {stable_mosaic.version = 11 : i64} {
  func.func @_rmsnorm_kernel(%arg0: i32, %arg1: memref<8x32xf32, #tpu.memory_space<vmem>>, %arg2: memref<8x1xf32, #tpu.memory_space<vmem>>, %arg3: memref<8x32xf32, #tpu.memory_space<vmem>>) attributes {dimension_semantics = [#tpu.dimension_semantics<parallel>], iteration_bounds = array<i64: 1>, scalar_prefetch = 0 : i64, scratch_operands = 0 : i64, tpu.core_type = #tpu.core_type<tc>, window_params = [{transform_indices = @transform_0, window_bounds = array<i64: 8, 32>}, {pipeline_mode = #tpu.pipeline_mode<synchronous>, transform_indices = @transform_1, window_bounds = array<i64: 8, 1>}, {transform_indices = @transform_2, window_bounds = array<i64: 8, 32>}]} {
    %c0 = arith.constant 0 : index
    %c0_0 = arith.constant 0 : index
    %0 = vector.load %arg1[%c0, %c0_0] : memref<8x32xf32, #tpu.memory_space<vmem>>, vector<8x32xf32>
    %c0_1 = arith.constant 0 : index
    %c0_2 = arith.constant 0 : index
    %1 = vector.load %arg2[%c0_1, %c0_2] : memref<8x1xf32, #tpu.memory_space<vmem>>, vector<8x1xf32>
    %2 = arith.mulf %0, %0 : vector<8x32xf32>
    %cst = arith.constant dense<0.000000e+00> : vector<32xf32>
    %3 = vector.multi_reduction <add>, %2, %cst [0] : vector<8x32xf32> to vector<32xf32>
    %4 = vector.shape_cast %3 : vector<32xf32> to vector<1x32xf32>
    %cst_3 = arith.constant 1.000000e-24 : f32
    %5 = vector.broadcast %cst_3 : f32 to vector<1x32xf32>
    %6 = arith.maximumf %4, %5 : vector<1x32xf32>
    %7 = math.rsqrt %6 : vector<1x32xf32>
    %8 = vector.broadcast %7 : vector<1x32xf32> to vector<8x32xf32>
    %9 = arith.mulf %0, %8 : vector<8x32xf32>
    %10 = vector.broadcast %1 : vector<8x1xf32> to vector<8x32xf32>
    %11 = arith.mulf %9, %10 : vector<8x32xf32>
    %c0_4 = arith.constant 0 : index
    %c0_5 = arith.constant 0 : index
    %12 = vector.load %arg3[%c0_4, %c0_5] : memref<8x32xf32, #tpu.memory_space<vmem>>, vector<8x32xf32>
    tpu.vector_store %arg3[%c0_4, %c0_5], %11 {strides = array<i32>} : memref<8x32xf32, #tpu.memory_space<vmem>>, vector<8x32xf32>,
    return
  }
  func.func @transform_0(%arg0: i32) -> (i32, i32) {
    %c0_i32 = arith.constant 0 : i32
    %c0_i32_0 = arith.constant 0 : i32
    return %c0_i32, %arg0 : i32, i32
  }
  func.func @transform_1(%arg0: i32) -> (i32, i32) {
    %c0_i32 = arith.constant 0 : i32
    %c0_i32_0 = arith.constant 0 : i32
    %c0_i32_1 = arith.constant 0 : i32
    return %c0_i32, %c0_i32_0 : i32, i32
  }
  func.func @transform_2(%arg0: i32) -> (i32, i32) {
    %c0_i32 = arith.constant 0 : i32
    %c0_i32_0 = arith.constant 0 : i32
    return %c0_i32, %arg0 : i32, i32
  }
}

</mosaic_0001>

<bundles_post_ra>
// kernel: tpu_custom_call.1
= control target key start
LH: loop header
LB: loop body
LE: loop exit
PB: predicated region body
PF: predicated region fallthrough
CT: control target
= control target key end

     0   :  { %s113_s0 = inlined_call_operand.vmem [shape: f32[8,32], index: 0, kind: input, shape index: {}]   ;;  %s114_s1 = inlined_call_operand.vmem [shape: f32[8,1], index: 1, kind: input, shape index: {}]   ;;  %s115_s2 = inlined_call_operand.hbm [shape: f32[8,32], index: 2, kind: output, shape index: {}]  }
   0x1   :  { %v13_v0 = vld [vmem:[%s114_s1] sm:$0xff] }
   0x2   :  { %7 = vsyncpa [#allocation3], 0  ;;  %v76_v1 = vmov 0   ;;  %v12_v2 = vld [vmem:[%s113_s0] sm:$0xff]  ;;  %vm15_vm0 = vcmask 261120   ;;  %s77_s1 = smov [#allocation2]  }
   0x3   :  { %49 = vset.pattern.permute.xlu0 %v76_v1  ;;  %v14_v3 = vmul.f32 %v12_v2, %v12_v2  ;;  %s39_s13 = sshll.u32 %s77_s1, 4  ;;  %s40_s13 = int_to_ptr.vmem [resolvable:$true] %s39_s13 }
   0x4   :  { %28 = vperm.xlu0 %49, %v13_v0   ;;  %s52_s0 = scalar_lea.vmem %s40_s13, 128  ;;  %p57_p1 = scmp.lt.s32.totalorder %s40_s13, %s40_s13 }
   0x5   :  { %v16_v4 = vsel %vm15_vm0, %v14_v3, 0.0  ;;  %p53_p0 = scmp.ne.s32.totalorder %s40_s13, %s52_s0  ;;  %p58_p2 = scmp.lt.s32.totalorder %s52_s0, %s52_s0 }
   0x6   :  { %v17_v5 = vrot.slane %v16_v4, 4 }
   0x7   :  { %p59_p3 = por %p58_p2, %p57_p1 }
   0x8   :  { %v18_v6 = vadd.f32 %v17_v5, %v16_v4 }
   0x9   :  { %p60_p4 = pnand %p59_p3, %p53_p0 }
   0xa   :  { %v19_v7 = vrot.slane %v18_v6, 2 }
   0xc   :  { %v20_v8 = vadd.f32 %v19_v7, %v18_v6 }
   0xe   :  { %v21_v9 = vrot.slane %v20_v8, 1 }
  0x10   :  { %v22_v10 = vadd.f32 %v21_v9, %v20_v8 }
  0x12   :  { %v23_v11 = vmax.f32 %v22_v10, 1e-24 }
  0x14   :  { %50 = vrsqrt.f32 %v23_v11 }
  0x1e   :  { %v51_v12 = vpop.eup %50 }
  0x1f   :  { %v25_v13 = vmul.f32 %v51_v12, %v12_v2 }
  0x83   :  { %v29_v14 = vpop.permute.xlu0 %28 }
  0x84   :  { %v31_v15 = vmul.f32 %v29_v14, %v25_v13 }
  0x86   :  { %32 = vst.msk [vmem:[#allocation2] sm:$0xff] %vm15_vm0, %v31_v15 }
  0x87   :  { %63 = shalt.err (!%p60_p4)
}
  0x88   :  { %s64_s16 = scalar_lea.hbm %s115_s2, 128 }
  0x89   :  { %p65_p5 = scmp.ne.s32.totalorder %s115_s2, %s64_s16  ;;  %p68_p6 = scmp.lt.u32.totalorder %s64_s16, %s115_s2 }
  0x8b   :  { %p70_p7 = pnand %p68_p6, %p65_p5 }
  0x8d   :  { %73 = shalt.err (!%p70_p7)
}
  0x8e   :  { %42 = dma.vmem_to_hbm [thread:$0]  %s40_s13, 128, %s115_s2, [#allocation3]  }
  0x8f   :  { %74 = dma.done.wait [#allocation3], 128  }
  0x90   :  { %75 = vsyncadd [#allocation3], 4294967168 }
  0x91   :  { %46 = vsyncpa [#allocation3], 1 }

</bundles_post_ra>
